<compile_context>
chip_gen: v7x
topology: tpu7x:2x2x1
jax: 0.10.0
libtpu: 0.0.40
codegen_flags: <defaults>
</compile_context>

<pallas_src>
import jax
import jax.numpy as jnp
from jax.experimental import pallas as pl
from jax.experimental.pallas import tpu as pltpu


def _round_up(n, m):
    return ((n + m - 1) // m) * m


def skipblock_kernel(x_ref, w_ref, b_ref, o_ref):
    # x_ref: (tile_m, F_pad)   -- f32 activation tile (pipelined)
    # w_ref: (F_pad, F_pad)    -- PyTorch (out_features, in_features) layout, whole in VMEM
    # b_ref: (1, F_pad)        -- f32 bias, whole in VMEM
    # o_ref: (tile_m, F_pad)
    x = x_ref[...]
    lhs = x.astype(w_ref.dtype)  # bf16 fast MXU path or f32; no-op if same dtype
    # x @ W^T folded into the contraction (contract lhs dim 1 with rhs dim 1).
    z = jax.lax.dot_general(
        lhs, w_ref[...],
        dimension_numbers=(((1,), (1,)), ((), ())),
        preferred_element_type=jnp.float32,
    ) + b_ref[...]
    silu = z * jax.nn.sigmoid(z)                  # f32 on VPU + EUP
    o_ref[...] = (silu + x.astype(jnp.float32)).astype(o_ref.dtype)


def skip_block(x, weight, bias, *, tile_m=512, matmul_dtype=None):
    """y = SiLU(x @ W^T + b) + x.

    x:      (..., F) float32
    weight: (F, F)   PyTorch (out_features, in_features) layout
    bias:   (F,)
    matmul_dtype: dtype fed to the MXU (jnp.bfloat16 recommended on v6e/v7x);
                  None keeps the weight's dtype (exact f32 path).
    """
    orig_shape = x.shape
    F = orig_shape[-1]
    x2d = x.reshape(-1, F)
    M = x2d.shape[0]

    # Lane-pad the feature axis to a multiple of 128 (only if needed).
    F_pad = _round_up(F, 128)

    # M tile: multiple of 8 (sublanes), as large as the budget allows, but keep
    # at least 2 grid steps so both v7x TensorCores get work via megacore.
    tm = min(_round_up(tile_m, 8), _round_up(M, 8))
    if M > 8 and pl.cdiv(M, tm) < 2:
        tm = _round_up(pl.cdiv(M, 2), 8)
    grid_m = pl.cdiv(M, tm)          # ragged last block handled by Pallas

    w_dtype = weight.dtype if matmul_dtype is None else matmul_dtype

    # Pad only when the feature dim is not lane-aligned (avoids an extra HBM
    # pass over the activations in the aligned case).
    xp = x2d if F_pad == F else jnp.pad(x2d, ((0, 0), (0, F_pad - F)))
    wp = weight.astype(w_dtype)
    bp = bias.astype(jnp.float32)
    if F_pad != F:
        wp = jnp.pad(wp, ((0, F_pad - F), (0, F_pad - F)))
        bp = jnp.pad(bp, (0, F_pad - F))
    bp = bp.reshape(1, F_pad)

    # VMEM budget: double-buffered x/out tiles + single-buffered W, b + headroom.
    x_item = jnp.dtype(x.dtype).itemsize
    vmem_bytes = (2 * 2 * tm * F_pad * x_item                    # x + out, 2 buffers each
                  + F_pad * F_pad * jnp.dtype(w_dtype).itemsize  # weight, 1 copy
                  + F_pad * 4                                    # bias
                  + (8 << 20))                                   # headroom
    vmem_bytes = int(min(max(vmem_bytes, 16 << 20), 64 << 20))   # v7x-safe cap

    out = pl.pallas_call(
        skipblock_kernel,
        out_shape=jax.ShapeDtypeStruct((M, F_pad), x.dtype),
        grid_spec=pltpu.PrefetchScalarGridSpec(
            num_scalar_prefetch=0,
            grid=(grid_m,),
            in_specs=[
                pl.BlockSpec((tm, F_pad), lambda i: (i, 0)),           # x tile (pipelined)
                pl.BlockSpec(memory_space=pltpu.MemorySpace.VMEM),     # weight: whole, 1 copy
                pl.BlockSpec(memory_space=pltpu.MemorySpace.VMEM),     # bias:   whole, 1 copy
            ],
            out_specs=pl.BlockSpec((tm, F_pad), lambda i: (i, 0)),
        ),
        compiler_params=pltpu.CompilerParams(
            dimension_semantics=("parallel",),
            vmem_limit_bytes=vmem_bytes,
        ),
    )(xp, wp, bp)

    if F_pad != F:
        out = out[:, :F]
    return out.reshape(orig_shape)


def reference_skip_block(x, weight, bias):
    z = jnp.einsum("...i,oi->...o", x, weight) + bias
    return z * jax.nn.sigmoid(z) + x


if __name__ == "__main__":
    key = jax.random.PRNGKey(0)
    k_x, k_w, k_b = jax.random.split(key, 3)

    batch, seq, nfeatures = 2, 8, 32          # M = batch*seq = 16 rows
    x = jax.random.normal(k_x, (batch, seq, nfeatures), dtype=jnp.float32)

    # Deterministic Linear(nfeatures, nfeatures) params (PyTorch-style uniform init).
    bound = 1.0 / jnp.sqrt(nfeatures)
    weight = jax.random.uniform(k_w, (nfeatures, nfeatures),
                                minval=-bound, maxval=bound, dtype=jnp.float32)
    bias = jax.random.uniform(k_b, (nfeatures,),
                              minval=-bound, maxval=bound, dtype=jnp.float32)

    y_ref = reference_skip_block(x, weight, bias)

    # f32 matmul path (exact).
    y = jax.block_until_ready(skip_block(x, weight, bias))
    assert jnp.allclose(y, y_ref, atol=1e-5, rtol=1e-5), "f32 path mismatch vs reference"

    # bf16 matmul path (v6e/v7x fast MXU path; f32 accumulate + f32 SiLU/residual).
    y_bf16 = jax.block_until_ready(
        skip_block(x, weight, bias, matmul_dtype=jnp.bfloat16))
    assert jnp.allclose(y_bf16, y_ref, atol=5e-2, rtol=5e-2), "bf16 path mismatch vs reference"

    print("KERNEL_OK")
</pallas_src>

<mosaic_0001>
module attributes {stable_mosaic.version = 11 : i64} {
  func.func @skipblock_kernel(%arg0: i32, %arg1: memref<8x128xf32, #tpu.memory_space<vmem>>, %arg2: memref<128x128xf32, #tpu.memory_space<vmem>>, %arg3: memref<1x128xf32, #tpu.memory_space<vmem>>, %arg4: memref<8x128xf32, #tpu.memory_space<vmem>>) attributes {dimension_semantics = [#tpu.dimension_semantics<parallel>], iteration_bounds = array<i64: 2>, scalar_prefetch = 0 : i64, scratch_operands = 0 : i64, tpu.core_type = #tpu.core_type<tc>, window_params = [{transform_indices = @transform_0, window_bounds = array<i64: 8, 128>}, {pipeline_mode = #tpu.pipeline_mode<synchronous>, transform_indices = @transform_1, window_bounds = array<i64: 128, 128>}, {pipeline_mode = #tpu.pipeline_mode<synchronous>, transform_indices = @transform_2, window_bounds = array<i64: 1, 128>}, {transform_indices = @transform_3, window_bounds = array<i64: 8, 128>}]} {
    %c0 = arith.constant 0 : index
    %c0_0 = arith.constant 0 : index
    %0 = vector.load %arg1[%c0, %c0_0] : memref<8x128xf32, #tpu.memory_space<vmem>>, vector<8x128xf32>
    %c0_1 = arith.constant 0 : index
    %c0_2 = arith.constant 0 : index
    %1 = vector.load %arg2[%c0_1, %c0_2] : memref<128x128xf32, #tpu.memory_space<vmem>>, vector<128x128xf32>
    %cst = arith.constant dense<0.000000e+00> : vector<8x128xf32>
    %2 = tpu.matmul %0, %1, %cst {dimension_numbers = #tpu.dot_dimension_numbers<[1], [1], [0], [0], [0, 0, 1, 0], [], []>} : vector<8x128xf32>, vector<128x128xf32>, vector<8x128xf32> -> vector<8x128xf32>
    %c0_3 = arith.constant 0 : index
    %c0_4 = arith.constant 0 : index
    %3 = vector.load %arg3[%c0_3, %c0_4] : memref<1x128xf32, #tpu.memory_space<vmem>>, vector<1x128xf32>
    %4 = vector.broadcast %3 : vector<1x128xf32> to vector<8x128xf32>
    %5 = arith.addf %2, %4 : vector<8x128xf32>
    %6 = arith.negf %5 : vector<8x128xf32>
    %7 = math.exp %6 : vector<8x128xf32>
    %cst_5 = arith.constant 1.000000e+00 : f32
    %8 = vector.broadcast %cst_5 : f32 to vector<8x128xf32>
    %9 = arith.addf %8, %7 : vector<8x128xf32>
    %10 = arith.divf %8, %9 : vector<8x128xf32>
    %11 = arith.mulf %5, %10 : vector<8x128xf32>
    %12 = arith.addf %11, %0 : vector<8x128xf32>
    %c0_6 = arith.constant 0 : index
    %c0_7 = arith.constant 0 : index
    %13 = vector.load %arg4[%c0_6, %c0_7] : memref<8x128xf32, #tpu.memory_space<vmem>>, vector<8x128xf32>
    tpu.vector_store %arg4[%c0_6, %c0_7], %12 {strides = array<i32>} : memref<8x128xf32, #tpu.memory_space<vmem>>, vector<8x128xf32>,
    return
  }
  func.func @transform_0(%arg0: i32) -> (i32, i32) {
    %c0_i32 = arith.constant 0 : i32
    %c0_i32_0 = arith.constant 0 : i32
    return %arg0, %c0_i32 : i32, i32
  }
  func.func @transform_1(%arg0: i32) -> (i32, i32) {
    %c0_i32 = arith.constant 0 : i32
    %c0_i32_0 = arith.constant 0 : i32
    %c0_i32_1 = arith.constant 0 : i32
    return %c0_i32, %c0_i32_0 : i32, i32
  }
  func.func @transform_2(%arg0: i32) -> (i32, i32) {
    %c0_i32 = arith.constant 0 : i32
    %c0_i32_0 = arith.constant 0 : i32
    %c0_i32_1 = arith.constant 0 : i32
    return %c0_i32, %c0_i32_0 : i32, i32
  }
  func.func @transform_3(%arg0: i32) -> (i32, i32) {
    %c0_i32 = arith.constant 0 : i32
    %c0_i32_0 = arith.constant 0 : i32
    return %arg0, %c0_i32 : i32, i32
  }
}

</mosaic_0001>

<bundles_post_ra>
// kernel: tpu_custom_call.1
= control target key start
LH: loop header
LB: loop body
LE: loop exit
PB: predicated region body
PF: predicated region fallthrough
CT: control target
= control target key end

     0   :  { %8 = vsyncpa [#allocation3], 0  ;;  %s920_s0 = inlined_call_operand.hbm [shape: f32[16,128], index: 0, kind: input, shape index: {}]   ;;  %s921_s1 = inlined_call_operand.hbm [shape: f32[128,128], index: 1, kind: input, shape index: {}]   ;;  %s922_s2 = inlined_call_operand.vmem [shape: f32[1,128], index: 2, kind: input, shape index: {}]   ;;  %s923_s3 = inlined_call_operand.hbm [shape: f32[16,128], index: 3, kind: output, shape index: {}]  }
   0x1   :  { %10 = vsyncpa [#allocation3 + $0x1], 0 }
   0x2   :  { %11 = vsyncpa [#allocation6], 0 }
   0x3   :  { %12 = vsyncpa [#allocation4], 0 }
   0x4   :  { %14 = vsyncpa [#allocation4 + $0x1], 0  ;;  %s714_s12 = smov 0   ;;  %s716_s13 = smov 0  }
   0x5   :  { %s718_s14 = smov 0   ;;  %s720_s15 = smov 0  }
   0x6 LB: > { %s735_s16 = sadd.s32 4294967295, %s684_s15   ;;  %s398_s17 = sadd.s32 4294967294, %s684_s15   ;;  %s684_s15 = sphi %s720_s15, %s943_s15   ;;  %s680_s14 = sphi %s718_s14, %s942_s14   ;;  %s676_s13 = sphi %s716_s13, %s941_s13   ;;  %s672_s12 = sphi %s714_s12, %s940_s12  }
   0x7   : > { %p40_p0 = scmp.ne.s32.totalorder %s676_s13, %s672_s12  ;;  %p924_p1 = scmp.eq.s32.totalorder %s735_s16, 0 }
   0x8   : > { %p112_p3 = scmp.eq.s32.totalorder %s398_s17, 1  ;;  %p399_p5 = scmp.ge.s32.totalorder %s684_s15, 1 }
   0x9   : > { %p744_p4 = por %p924_p1, %p40_p0  ;;  %p119_p7 = scmp.lt.s32.totalorder %s684_s15, 3 }
   0xa   : > { %p749_p6 = por %p112_p3, %p40_p0  ;;  %s686_s21 = smov [#allocation5]  }
   0xb   : > { %s927_s18 = scalar_select %p744_p4, 1, 0 }
   0xc   : > { %s928_s19 = scalar_select %p749_p6, 1, 0 }
   0xd   : > { %p754_p8 = pnand %p399_p5, %p119_p7  ;;  %s131_s22 = sshll.u32 %s686_s21, 4  ;;  %s758_s22 = int_to_ptr.vmem [resolvable:$true] %s131_s22 }
   0xe   : > { %s770_s24 = sadd.s32 1, %s684_s15   ;;  %s27_s25 = sadd.s32 1, %s680_s14 }
   0xf   : > { %s929_s20 = scalar_select %p754_p8, 1, 0 }
  0x10   : > { %p498_p9 = pneg %p754_p8  ;;  %s24_s26 = ssub.s32 %s684_s15, %s770_s24 }
  0x11   : > { %s556_s29 = scalar_lea.hbm %s921_s1, 2048 }
  0x12   : > { %p765_p11 = pnand %p498_p9, %p924_p1  ;;  %p557_p12 = scmp.ne.s32.totalorder %s921_s1, %s556_s29 }
  0x13   : > { %p563_p5 = scmp.lt.u32.totalorder %s556_s29, %s921_s1 }
  0x14   : > { %p558_p13 = pneg %p765_p11 }
  0x16   : > { %p559_p0 = pnand %p558_p13, %p557_p12 }
  0x18   : > { %p560_p3 = pneg %p559_p0 }
  0x1a   : > { %p565_p7 = pnand %p563_p5, %p560_p3 }
  0x1c   : > { %568 = shalt.err (!%p565_p7)
}
  0x1d   : > { %s569_s7 = scalar_lea.vmem %s758_s22, 2048  ;;  %p577_p2 = scmp.lt.s32.totalorder %s758_s22, %s758_s22 }
  0x1e   : > { %p570_p9 = scmp.ne.s32.totalorder %s758_s22, %s569_s7  ;;  %p578_p6 = scmp.lt.s32.totalorder %s569_s7, %s569_s7 }
  0x20   : > { %p572_p10 = pnand %p570_p9, %p558_p13  ;;  %p579_p4 = por %p578_p6, %p577_p2 }
  0x22   : > { %p573_p1 = pneg %p572_p10 }
  0x24   : > { %p580_p8 = pnand %p579_p4, %p573_p1 }
  0x26   : > { %583 = shalt.err (!%p580_p8)
}
  0x27   : > { %s687_s8 = smov 128   ;;  %s688_s9 = smov 8  }
  0x28   : > { %501 = dma.hbm_to_vmem [thread:$0]  (!%p765_p11), %s921_s1, 2048, %s758_s22, [#allocation6], %s687_s8, %s687_s8, %s688_s9  }
  0x29   : > { %p25_p2 = scmp.eq.s32.totalorder %s24_s26, 0  ;;  %p34_p1 = scmp.ne.s32.totalorder %s680_s14, %s676_s13 }
  0x2a   : > { %p35_p4 = scmp.eq.s32.totalorder %s684_s15, 0  ;;  %p511_p6 = scmp.lt.s32.totalorder %s684_s15, 2 }
  0x2b   : > { %s801_s17 = scalar_select %p25_p2, %s680_s14, %s27_s25  }
  0x2c   : > { %p36_p8 = por %p35_p4, %p34_p1  ;;  %p931_p10 = scmp.eq.s32.totalorder %s735_s16, 1 }
  0x2d   : > { %s148_s27 = sand.u32 1, %s680_s14   ;;  %s403_s28 = sshll.u32 %s684_s15, 7 }
  0x2e   : > { %p805_p12 = por %p931_p10, %p34_p1  ;;  %s402_s29 = sshll.u32 %s148_s27, 3 }
  0x2f   : > { %s814_s4 = scalar_lea.hbm %s920_s0, %s403_s28  ;;  %s152_s22 = scalar_lea.vmem [#allocation2], %s402_s29 }
  0x30   : > { %s159_s25 = sshll.u32 %s152_s22, 4  ;;  %p816_p11 = pnand %p511_p6, %p36_p8  ;;  %s820_s25 = int_to_ptr.vmem [resolvable:$true] %s159_s25 }
  0x31   : > { %s149_s5 = scalar_lea.sflag [#allocation3], %s148_s27  ;;  %s584_s6 = scalar_lea.hbm %s814_s4, 128 }
  0x32   : > { %p585_p13 = scmp.ne.s32.totalorder %s814_s4, %s584_s6  ;;  %p586_p0 = pneg %p816_p11 }
  0x33   : > { %s589_s9 = scalar_lea.hbm %s920_s0, 256  ;;  %p590_p7 = scmp.lt.u32.totalorder %s814_s4, %s920_s0 }
  0x34   : > { %p587_p3 = pnand %p586_p0, %p585_p13  ;;  %p591_p9 = scmp.lt.u32.totalorder %s589_s9, %s584_s6 }
  0x35   : > { %p593_p1 = scmp.lt.u32.totalorder %s584_s6, %s814_s4 }
  0x36   : > { %p588_p5 = pneg %p587_p3  ;;  %p592_p2 = por %p591_p9, %p590_p7 }
  0x38   : > { %p594_p4 = por %p593_p1, %p592_p2 }
  0x3a   : > { %p595_p6 = pnand %p594_p4, %p588_p5 }
  0x3c   : > { %598 = shalt.err (!%p595_p6)
}
  0x3d   : > { %s599_s27 = scalar_lea.vmem %s820_s25, 128  ;;  %s689_s28 = smov [#allocation2]  }
  0x3e   : > { %p600_p8 = scmp.ne.s32.totalorder %s820_s25, %s599_s27  ;;  %s604_s29 = sshll.u32 %s689_s28, 4  ;;  %s605_s29 = int_to_ptr.vmem [resolvable:$false] %s604_s29 }
  0x3f   : > { %s606_s23 = scalar_lea.vmem %s605_s29, 256  ;;  %p607_p3 = scmp.lt.s32.totalorder %s820_s25, %s605_s29 }
  0x40   : > { %p602_p10 = pnand %p600_p8, %p586_p0  ;;  %p608_p7 = scmp.lt.s32.totalorder %s606_s23, %s599_s27 }
  0x42   : > { %p603_p13 = pneg %p602_p10  ;;  %p609_p9 = por %p608_p7, %p607_p3 }
  0x44   : > { %p610_p2 = pnand %p609_p9, %p603_p13 }
  0x46   : > { %613 = shalt.err (!%p610_p2)
}
  0x47   : > { %505 = dma.hbm_to_vmem [thread:$0]  (!%p816_p11), %s814_s4, 128, %s820_s25, %s149_s5  }
  0x48   : > { %p934_p5 = scmp.ne.s32.totalorder %s929_s20, 0 }
  0x49   : > { %s850_s30 = sand.u32 (!%p934_p5), 1, %s676_s13   ;;  %p935_p0 = scmp.ne.s32.totalorder (!%p934_p5), %s927_s18, 0 }
  0x4a   : > { %168 = sbr.rel (%p934_p5) target bundleno = 409 (0x199), region = 32  ;;  %s405_s22 = sshll.u32 (!%p934_p5), %s850_s30, 3 }
  0x4b   : > { %s171_s6 = scalar_lea.sflag (!%p934_p5), [#allocation3], %s850_s30  ;;  %s856_s7 = scalar_lea.vmem (!%p934_p5), [#allocation2], %s405_s22 }
  0x51   : > { %659 = dma.done.wait (%p935_p0), %s171_s6, 128  }
  0x52   : > { %661 = vsyncadd (%p935_p0), %s171_s6, 4294967168  ;;  %p936_p11 = scmp.eq.s32.totalorder %s735_s16, 0 }
  0x54   : > { %663 = dma.done.wait (%p936_p11), [#allocation6], 2048   ;;  %p937_p1 = pmov %p936_p11 }
  0x55   : > { %v690_v0 = vmov 0.0|0.0   ;;  %vm691_vm0 = vmmov 0   ;;  %v692_v1 = vmov 0.0   ;;  %v202_v2 = vld [vmem:[#allocation5] sm:$0xff]  ;;  %v203_v3 = vld [vmem:[#allocation5 + $0x8] sm:$0xff]  ;;  %v204_v5 = vld [vmem:[#allocation5 + $0x10] sm:$0xff] }
  0x56   : > { %665 = vsyncadd (%p937_p1), [#allocation6], 4294965248  ;;  %466 = vmatprep.subr.bf16.mxu0 %v690_v0  ;;  %463 = vmatprep.mubr.msk.f32.mxu0 %vm691_vm0, %v692_v1  ;;  %v467_v4 = vpack.c.bf16 %v203_v3, %v202_v2  ;;  %v205_v6 = vld [vmem:[#allocation5 + $0x18] sm:$0xff]  ;;  %v206_v8 = vld [vmem:[#allocation5 + $0x20] sm:$0xff]  ;;  %s411_s4 = sshll.u32 %s735_s16, 7  ;;  %s200_s25 = scalar_lea.vmem [#allocation7], %s405_s22 }
  0x57   : > { %v470_v7 = vpack.c.bf16 %v205_v6, %v204_v5  ;;  %v207_v9 = vld [vmem:[#allocation5 + $0x28] sm:$0xff]  ;;  %v208_v11 = vld [vmem:[#allocation5 + $0x30] sm:$0xff]  ;;  %v209_v12 = vld [vmem:[#allocation5 + $0x38] sm:$0xff]  ;;  %s318_s26 = sshll.u32 %s200_s25, 4  ;;  %s876_s9 = scalar_lea.hbm %s923_s3, %s411_s4  ;;  %s878_s26 = int_to_ptr.vmem [resolvable:$true] %s318_s26 }
  0x58   : > { %468 = vmatpush3.bf16.xpose.msra.mxu0 %v467_v4  ;;  %v473_v10 = vpack.c.bf16 %v207_v9, %v206_v8  ;;  %v476_v13 = vpack.c.bf16 %v209_v12, %v208_v11  ;;  %v210_v14 = vld [vmem:[#allocation5 + $0x40] sm:$0xff]  ;;  %v211_v15 = vld [vmem:[#allocation5 + $0x48] sm:$0xff]  ;;  %v212_v17 = vld [vmem:[#allocation5 + $0x50] sm:$0xff]  ;;  %s305_s10 = scalar_lea.sflag [#allocation4], %s850_s30  ;;  %s614_s11 = scalar_lea.vmem %s878_s26, 128 }
  0x59   : > { %469 = vmatprep.subr.bf16.mxu0 %v690_v0  ;;  %v479_v16 = vpack.c.bf16 %v211_v15, %v210_v14  ;;  %v213_v18 = vld [vmem:[#allocation5 + $0x58] sm:$0xff]  ;;  %v214_v20 = vld [vmem:[#allocation5 + $0x60] sm:$0xff]  ;;  %v215_v21 = vld [vmem:[#allocation5 + $0x68] sm:$0xff]  ;;  %p615_p4 = scmp.ne.s32.totalorder %s878_s26, %s614_s11  ;;  %s693_s16 = smov [#allocation7]  }
  0x5a   : > { %v482_v19 = vpack.c.bf16 %v213_v18, %v212_v17  ;;  %v485_v22 = vpack.c.bf16 %v215_v21, %v214_v20  ;;  %v216_v23 = vld [vmem:[#allocation5 + $0x70] sm:$0xff]  ;;  %v217_v24 = vld [vmem:[#allocation5 + $0x78] sm:$0xff]  ;;  %s618_s27 = sshll.u32 %s693_s16, 4  ;;  %s619_s27 = int_to_ptr.vmem [resolvable:$false] %s618_s27 }
  0x5b   : > { %v488_v25 = vpack.c.bf16 %v217_v24, %v216_v23  ;;  %v201_v26 = vld [vmem:[%s856_s7] sm:$0xff]  ;;  %p616_p6 = pnand %p615_p4, %p805_p12  ;;  %s620_s28 = scalar_lea.vmem %s619_s27, 256 }
  0x5c   : > { %v408_v27 = vld [vmem:[%s922_s2] ss:$0 sm:$0xff]  ;;  %p621_p10 = scmp.lt.s32.totalorder %s878_s26, %s619_s27  ;;  %p622_p13 = scmp.lt.s32.totalorder %s620_s28, %s614_s11 }
  0x5d   : > { %p617_p8 = pneg %p616_p6 }
  0x5e   : > { %p623_p3 = por %p622_p13, %p621_p10 }
  0x60   : > { %471 = vmatpush3.bf16.xpose.msra.mxu0 %v470_v7  ;;  %p624_p7 = pnand %p623_p3, %p617_p8 }
  0x61   : > { %472 = vmatprep.subr.bf16.mxu0 %v690_v0 }
  0x68   : > { %474 = vmatpush3.bf16.xpose.msra.mxu0 %v473_v10 }
  0x69   : > { %475 = vmatprep.subr.bf16.mxu0 %v690_v0 }
  0x70   : > { %477 = vmatpush3.bf16.xpose.msra.mxu0 %v476_v13 }
  0x71   : > { %478 = vmatprep.subr.bf16.mxu0 %v690_v0 }
  0x78   : > { %480 = vmatpush3.bf16.xpose.msra.mxu0 %v479_v16 }
  0x79   : > { %481 = vmatprep.subr.bf16.mxu0 %v690_v0 }
  0x80   : > { %483 = vmatpush3.bf16.xpose.msra.mxu0 %v482_v19 }
  0x81   : > { %484 = vmatprep.subr.bf16.mxu0 %v690_v0 }
  0x88   : > { %486 = vmatpush3.bf16.xpose.msra.mxu0 %v485_v22 }
  0x89   : > { %487 = vmatprep.subr.bf16.mxu0 %v690_v0 }
  0x90   : > { %489 = vmatpush3.bf16.xpose.msra.mxu0 %v488_v25 }
  0x97   : > { %464 = vmatmul.mubr.f32.vlgmr.msra.gmra.mrb[0].mxu0 %v201_v26 }
 0x16a   : > { %v291_v28 = vpop.f32.mrb[0].mxu0 }
 0x16b   : > { %v292_v29 = vadd.f32 %v408_v27, %v291_v28  ;;  %v465_v30 = vpop.f32.mrb[1].mxu0 }
 0x16d   : > { %v409_v31 = vmul.f32 -1.442695, %v292_v29 }
 0x16f   : > { %552 = vpow2.f32 %v409_v31 }
 0x179   : > { %v553_v32 = vpop.eup %552 }
 0x17a   : > { %v298_v33 = vadd.f32 1.0, %v553_v32 }
 0x17c   : > { %554 = vrcp.f32 %v298_v33 }
 0x186   : > { %v555_v34 = vpop.eup %554 }
 0x187   : > { %v301_v35 = vmul.f32 %v555_v34, %v292_v29 }
 0x189   : > { %v302_v36 = vadd.f32 %v301_v35, %v201_v26 }
 0x18b   : > { %303 = vst [vmem:[%s200_s25] sm:$0xff] %v302_v36 }
 0x18c   : > { %627 = shalt.err (!%p624_p7)
}
 0x18d   : > { %s628_s29 = scalar_lea.hbm %s876_s9, 128  ;;  %s632_s22 = scalar_lea.hbm %s923_s3, 256 }
 0x18e   : > { %p629_p9 = scmp.ne.s32.totalorder %s876_s9, %s628_s29  ;;  %p633_p0 = scmp.lt.u32.totalorder %s876_s9, %s923_s3 }
 0x18f   : > { %p634_p11 = scmp.lt.u32.totalorder %s632_s22, %s628_s29  ;;  %p636_p4 = scmp.lt.u32.totalorder %s628_s29, %s876_s9 }
 0x190   : > { %p630_p2 = pnand %p629_p9, %p805_p12 }
 0x191   : > { %p635_p1 = por %p634_p11, %p633_p0 }
 0x192   : > { %p631_p5 = pneg %p630_p2 }
 0x193   : > { %p637_p6 = por %p636_p4, %p635_p1 }
 0x195   : > { %p638_p8 = pnand %p637_p6, %p631_p5 }
 0x197   : > { %641 = shalt.err (!%p638_p8)
}
 0x198   : > { %496 = dma.vmem_to_hbm [thread:$0]  (%p805_p12), %s878_s26, 128, %s876_s9, %s305_s10  }
 0x199 PF: > { %s330_s18 = sand.u32 1, %s672_s12   ;;  %p938_p10 = scmp.ne.s32.totalorder %s928_s19, 0 }
 0x19a   : > { %p939_p13 = scmp.ge.s32.totalorder %s684_s15, 2  ;;  %s331_s20 = scalar_lea.sflag [#allocation4], %s330_s18 }
 0x19c   : > { %p507_p3 = pnand %p939_p13, %p938_p10 }
 0x19e   : > { %667 = dma.done.wait (!%p507_p3), %s331_s20, 128  }
 0x19f   : > { %669 = vsyncadd (!%p507_p3), %s331_s20, 4294967168  ;;  %p17_p7 = scmp.ge.s32.totalorder %s770_s24, 4   ;;  %s940_s12 = smov %s676_s13 }
 0x1a0   : > { %s941_s13 = smov %s680_s14  ;;  %s942_s14 = smov %s801_s17 }
 0x1a1   : > { %s943_s15 = smov %s770_s24  ;;  %19 = sbr.rel (!%p17_p7) target bundleno = 6 (0x6), region = 81 }
 0x1a8   :  { %336 = vsyncpa [#allocation3], 1 }
 0x1a9   :  { %338 = vsyncpa [#allocation3 + $0x1], 1 }
 0x1aa   :  { %339 = vsyncpa [#allocation6], 1 }
 0x1ab   :  { %340 = vsyncpa [#allocation4], 1 }
 0x1ac   :  { %342 = vsyncpa [#allocation4 + $0x1], 1 }

</bundles_post_ra>
